<compile_context>
chip_gen: v6e
topology: v6e:2x2x1
jax: 0.10.0
libtpu: 0.0.40
codegen_flags: <defaults>
</compile_context>

<pallas_src>
import functools

import jax
import jax.numpy as jnp
from jax import lax
from jax.experimental import pallas as pl
from jax.experimental.pallas import tpu as pltpu


# ---------------------------------------------------------------------------
# Helpers
# ---------------------------------------------------------------------------
def _round_up(x, m):
    return ((x + m - 1) // m) * m


def _pick_blocks(rows, hw, itemsize, *, tile_bytes, max_hw_blk=2048,
                 prefer_two_row_blocks=False):
    """Pick (row_blk, hw_blk): hw_blk multiple of 128, row_blk multiple of the sublane
    packing, tile <= tile_bytes.  Works for any rows / hw (tails are masked / partial)."""
    sub = max(8, 32 // itemsize)                # 8 for f32, 16 for bf16, 32 for int8
    hw_pad = _round_up(hw, 128)
    rows_pad = _round_up(rows, sub)
    hw_blk = min(hw_pad, max_hw_blk)            # lane-dense, bounded
    row_cap = max(sub, (tile_bytes // (hw_blk * itemsize)) // sub * sub)
    row_blk = min(rows_pad, row_cap)
    if prefer_two_row_blocks and row_blk >= rows_pad and rows_pad >= 2 * sub:
        # Give the 'parallel' row axis at least 2 blocks (v7x megacore utilization).
        row_blk = _round_up(rows_pad // 2, sub)
    return row_blk, hw_blk


# ---------------------------------------------------------------------------
# Kernels
# ---------------------------------------------------------------------------
def _stats_kernel(x_ref, sum_ref, sq_ref, *, hw, hw_blk, mask_tail):
    """Accumulate per-row sum(x) and sum(x*x) into lane-wide (row_blk, 128) f32
    resident accumulators (output blocks), over the HW grid axis."""

    @pl.when(pl.program_id(1) == 0)
    def _():
        sum_ref[...] = jnp.zeros_like(sum_ref)
        sq_ref[...] = jnp.zeros_like(sq_ref)

    row_blk = sum_ref.shape[0]
    n_chunks = hw_blk // 128

    if mask_tail:
        lane = lax.broadcasted_iota(jnp.int32, (row_blk, 128), 1)
        base = pl.program_id(1) * hw_blk

    s = sum_ref[...]
    q = sq_ref[...]
    for j in range(n_chunks):                           # static, <= 16 iterations
        c = x_ref[:, pl.ds(j * 128, 128)].astype(jnp.float32)
        if mask_tail:
            c = jnp.where(base + (j * 128) + lane < hw, c, 0.0)
        s = s + c
        q = q + c * c
    sum_ref[...] = s
    sq_ref[...] = q


def _norm_kernel(x_ref, scale_ref, shift_ref, out_ref):
    """out = x * scale + shift, with (row_blk, 1) scale/shift lane-broadcast over HW."""
    x = x_ref[...].astype(jnp.float32)                  # (row_blk, hw_blk)
    out_ref[...] = (x * scale_ref[...] + shift_ref[...]).astype(out_ref.dtype)


# ---------------------------------------------------------------------------
# Wrapper
# ---------------------------------------------------------------------------
def adaptive_instance_norm(x, style, w_orig, bias, bn_weight, bn_bias, eps=1e-5):
    """x: (N, C, H, W); style: (N, style_dim)."""
    N, C, H, W = x.shape
    HW = H * W
    NC = N * C
    itemsize = x.dtype.itemsize
    vmem_limit = 32 * 1024 * 1024

    # --- EqualLinear (tiny matmul, done in XLA, hoisted out of the kernels) ---
    style2 = style.reshape(N, -1).astype(jnp.float32)           # torch.flatten(style, 1)
    S = style2.shape[1]
    w_eff = w_orig.astype(jnp.float32) * jnp.sqrt(jnp.float32(2.0 / S))   # equal_lr scale
    st = style2 @ w_eff.T + bias.astype(jnp.float32)            # (N, 2C)
    gamma = st[:, :C]                                           # (N, C)
    beta = st[:, C:]                                            # (N, C)

    # Sublane-dense layout: rows = (n, c) pairs, lanes = HW.
    x_flat = x.reshape(NC, HW)

    # --- Pass 1: per-(n, c) partial sums (single sweep over x) ---
    row_blk_s, hw_blk_s = _pick_blocks(NC, HW, itemsize, tile_bytes=4 * 1024 * 1024,
                                       prefer_two_row_blocks=True)
    n_row_s = pl.cdiv(NC, row_blk_s)
    n_hw_s = pl.cdiv(HW, hw_blk_s)
    rows_out = n_row_s * row_blk_s              # padded rows -> no partial output blocks
    mask_tail = (HW % hw_blk_s) != 0

    stats_kernel = functools.partial(_stats_kernel, hw=HW, hw_blk=hw_blk_s,
                                     mask_tail=mask_tail)
    sums, sqs = pl.pallas_call(
        stats_kernel,
        out_shape=(jax.ShapeDtypeStruct((rows_out, 128), jnp.float32),
                   jax.ShapeDtypeStruct((rows_out, 128), jnp.float32)),
        grid=(n_row_s, n_hw_s),
        in_specs=[pl.BlockSpec((row_blk_s, hw_blk_s), lambda r, h: (r, h))],
        out_specs=[pl.BlockSpec((row_blk_s, 128), lambda r, h: (r, 0)),
                   pl.BlockSpec((row_blk_s, 128), lambda r, h: (r, 0))],
        compiler_params=pltpu.CompilerParams(
            dimension_semantics=("parallel", "arbitrary"),
            vmem_limit_bytes=vmem_limit),
        cost_estimate=pl.CostEstimate(
            flops=3 * NC * HW, transcendentals=0,
            bytes_accessed=NC * HW * itemsize + 2 * rows_out * 128 * 4),
    )(x_flat)

    # --- BatchNorm2d training-mode batch statistics (over N and HW), tiny XLA reduce ---
    count = jnp.float32(N * HW)
    sum_c = jnp.sum(sums[:NC].reshape(N, C, 128), axis=(0, 2))  # (C,)
    sq_c = jnp.sum(sqs[:NC].reshape(N, C, 128), axis=(0, 2))    # (C,)
    mean = sum_c / count
    var = jnp.maximum(sq_c / count - mean * mean, 0.0)          # biased variance
    inv = lax.rsqrt(var + jnp.float32(eps))                     # (C,)
    # TODO(synk): BatchNorm2d running_mean/running_var buffer updates (training-mode
    # side effect) are not modeled; the forward output does not depend on them.

    # --- Fold bn affine + AdaIN affine into per-(n, c) scale / shift ---
    bnw = bn_weight.astype(jnp.float32)
    bnb = bn_bias.astype(jnp.float32)
    chan_scale = bnw * inv                                      # (C,)
    scale = (gamma * chan_scale[None, :]).reshape(NC, 1)
    shift = (beta + gamma * (bnb - chan_scale * mean)[None, :]).reshape(NC, 1)

    # --- Pass 2: out = x * scale + shift, lane-dense tiles, double-buffered ---
    row_blk_n, hw_blk_n = _pick_blocks(NC, HW, itemsize, tile_bytes=2 * 1024 * 1024)
    n_row_n = pl.cdiv(NC, row_blk_n)
    n_hw_n = pl.cdiv(HW, hw_blk_n)

    out = pl.pallas_call(
        _norm_kernel,
        out_shape=jax.ShapeDtypeStruct((NC, HW), x.dtype),
        grid=(n_row_n, n_hw_n),
        in_specs=[
            pl.BlockSpec((row_blk_n, hw_blk_n), lambda r, h: (r, h)),
            pl.BlockSpec((row_blk_n, 1), lambda r, h: (r, 0)),
            pl.BlockSpec((row_blk_n, 1), lambda r, h: (r, 0)),
        ],
        out_specs=pl.BlockSpec((row_blk_n, hw_blk_n), lambda r, h: (r, h)),
        compiler_params=pltpu.CompilerParams(
            dimension_semantics=("parallel", "parallel"),
            vmem_limit_bytes=vmem_limit),
        cost_estimate=pl.CostEstimate(
            flops=2 * NC * HW, transcendentals=0,
            bytes_accessed=2 * NC * HW * itemsize + 2 * NC * 4),
    )(x_flat, scale, shift)

    return out.reshape(N, C, H, W)


# ---------------------------------------------------------------------------
# Test
# ---------------------------------------------------------------------------
def _reference(x, style, w_orig, bias, bn_weight, bn_bias, eps=1e-5):
    N, C = x.shape[0], x.shape[1]
    S = style.shape[1]
    w_eff = w_orig * jnp.sqrt(2.0 / S)
    st = style @ w_eff.T + bias
    gamma = st[:, :C][:, :, None, None]
    beta = st[:, C:][:, :, None, None]
    mean = x.mean(axis=(0, 2, 3), keepdims=True)
    var = ((x - mean) ** 2).mean(axis=(0, 2, 3), keepdims=True)
    xn = (x - mean) / jnp.sqrt(var + eps)
    xn = xn * bn_weight[None, :, None, None] + bn_bias[None, :, None, None]
    return gamma * xn + beta


if __name__ == "__main__":
    key = jax.random.PRNGKey(0)
    adain = jax.jit(adaptive_instance_norm)

    # Config 1: nice shapes (HW multiple of 128).  Config 2: ragged shapes that
    # exercise the lane-tail masking and partial row blocks.
    configs = [(2, 4, 16, 16, 8), (2, 6, 10, 10, 8)]
    for N, C, H, W, S in configs:
        k1, k2, k3, key = jax.random.split(key, 4)
        x = jax.random.normal(k1, (N, C, H, W), jnp.float32)
        style = jax.random.normal(k2, (N, S), jnp.float32)

        # Parameter init mirroring __init__:
        #   linear.weight.data.normal_() -> standard normal (pre-equal_lr scaling)
        #   bias[:C] = 1, bias[C:] = 0; BatchNorm2d affine: weight = 1, bias = 0
        w_orig = jax.random.normal(k3, (2 * C, S), jnp.float32)
        bias = jnp.concatenate([jnp.ones((C,), jnp.float32),
                                jnp.zeros((C,), jnp.float32)])
        bn_weight = jnp.ones((C,), jnp.float32)
        bn_bias = jnp.zeros((C,), jnp.float32)

        out = adain(x, style, w_orig, bias, bn_weight, bn_bias)
        out = jax.block_until_ready(out)

        ref = _reference(x, style, w_orig, bias, bn_weight, bn_bias)
        err = float(jnp.max(jnp.abs(out - ref)))
        assert jnp.allclose(out, ref, atol=1e-4, rtol=1e-4), (N, C, H, W, err)

    print("KERNEL_OK")
</pallas_src>

<mosaic_0001>
module attributes {stable_mosaic.version = 11 : i64} {
  func.func @_stats_kernel(%arg0: i32, %arg1: i32, %arg2: memref<8x256xf32, #tpu.memory_space<vmem>>, %arg3: memref<8x128xf32, #tpu.memory_space<vmem>>, %arg4: memref<8x128xf32, #tpu.memory_space<vmem>>) attributes {dimension_semantics = [#tpu.dimension_semantics<parallel>, #tpu.dimension_semantics<arbitrary>], iteration_bounds = array<i64: 1, 1>, scalar_prefetch = 0 : i64, scratch_operands = 0 : i64, tpu.core_type = #tpu.core_type<tc>, window_params = [{transform_indices = @transform_0, window_bounds = array<i64: 8, 256>}, {transform_indices = @transform_1, window_bounds = array<i64: 8, 128>}, {transform_indices = @transform_2, window_bounds = array<i64: 8, 128>}]} {
    %c0_i32 = arith.constant 0 : i32
    %0 = arith.cmpi eq, %arg1, %c0_i32 : i32
    %1 = arith.extui %0 : i1 to i32
    %c0_i32_0 = arith.constant 0 : i32
    %2 = arith.cmpi ne, %1, %c0_i32_0 : i32
    scf.if %2 {
      %cst = arith.constant 0.000000e+00 : f32
      %15 = vector.broadcast %cst : f32 to vector<8x128xf32>
      %c0_11 = arith.constant 0 : index
      %c0_12 = arith.constant 0 : index
      %16 = vector.load %arg3[%c0_11, %c0_12] : memref<8x128xf32, #tpu.memory_space<vmem>>, vector<8x128xf32>
      tpu.vector_store %arg3[%c0_11, %c0_12], %15 {strides = array<i32>} : memref<8x128xf32, #tpu.memory_space<vmem>>, vector<8x128xf32>,
      %cst_13 = arith.constant 0.000000e+00 : f32
      %17 = vector.broadcast %cst_13 : f32 to vector<8x128xf32>
      %c0_14 = arith.constant 0 : index
      %c0_15 = arith.constant 0 : index
      %18 = vector.load %arg4[%c0_14, %c0_15] : memref<8x128xf32, #tpu.memory_space<vmem>>, vector<8x128xf32>
      tpu.vector_store %arg4[%c0_14, %c0_15], %17 {strides = array<i32>} : memref<8x128xf32, #tpu.memory_space<vmem>>, vector<8x128xf32>,
    } else {
    }
    %c0 = arith.constant 0 : index
    %c0_1 = arith.constant 0 : index
    %3 = vector.load %arg3[%c0, %c0_1] : memref<8x128xf32, #tpu.memory_space<vmem>>, vector<8x128xf32>
    %c0_2 = arith.constant 0 : index
    %c0_3 = arith.constant 0 : index
    %4 = vector.load %arg4[%c0_2, %c0_3] : memref<8x128xf32, #tpu.memory_space<vmem>>, vector<8x128xf32>
    %c0_4 = arith.constant 0 : index
    %c0_5 = arith.constant 0 : index
    %5 = vector.load %arg2[%c0_4, %c0_5] : memref<8x256xf32, #tpu.memory_space<vmem>>, vector<8x128xf32>
    %6 = arith.addf %3, %5 : vector<8x128xf32>
    %7 = arith.mulf %5, %5 : vector<8x128xf32>
    %8 = arith.addf %4, %7 : vector<8x128xf32>
    %c0_6 = arith.constant 0 : index
    %c128 = arith.constant 128 : index
    %9 = vector.load %arg2[%c0_6, %c128] : memref<8x256xf32, #tpu.memory_space<vmem>>, vector<8x128xf32>
    %10 = arith.addf %6, %9 : vector<8x128xf32>
    %11 = arith.mulf %9, %9 : vector<8x128xf32>
    %12 = arith.addf %8, %11 : vector<8x128xf32>
    %c0_7 = arith.constant 0 : index
    %c0_8 = arith.constant 0 : index
    %13 = vector.load %arg3[%c0_7, %c0_8] : memref<8x128xf32, #tpu.memory_space<vmem>>, vector<8x128xf32>
    tpu.vector_store %arg3[%c0_7, %c0_8], %10 {strides = array<i32>} : memref<8x128xf32, #tpu.memory_space<vmem>>, vector<8x128xf32>,
    %c0_9 = arith.constant 0 : index
    %c0_10 = arith.constant 0 : index
    %14 = vector.load %arg4[%c0_9, %c0_10] : memref<8x128xf32, #tpu.memory_space<vmem>>, vector<8x128xf32>
    tpu.vector_store %arg4[%c0_9, %c0_10], %12 {strides = array<i32>} : memref<8x128xf32, #tpu.memory_space<vmem>>, vector<8x128xf32>,
    return
  }
  func.func @transform_0(%arg0: i32, %arg1: i32) -> (i32, i32) {
    %c0_i32 = arith.constant 0 : i32
    return %arg0, %arg1 : i32, i32
  }
  func.func @transform_1(%arg0: i32, %arg1: i32) -> (i32, i32) {
    %c0_i32 = arith.constant 0 : i32
    %c0_i32_0 = arith.constant 0 : i32
    return %arg0, %c0_i32 : i32, i32
  }
  func.func @transform_2(%arg0: i32, %arg1: i32) -> (i32, i32) {
    %c0_i32 = arith.constant 0 : i32
    %c0_i32_0 = arith.constant 0 : i32
    return %arg0, %c0_i32 : i32, i32
  }
}

module attributes {stable_mosaic.version = 11 : i64} {
  func.func @_norm_kernel(%arg0: i32, %arg1: i32, %arg2: memref<8x256xf32, #tpu.memory_space<vmem>>, %arg3: memref<8x1xf32, #tpu.memory_space<vmem>>, %arg4: memref<8x1xf32, #tpu.memory_space<vmem>>, %arg5: memref<8x256xf32, #tpu.memory_space<vmem>>) attributes {dimension_semantics = [#tpu.dimension_semantics<parallel>, #tpu.dimension_semantics<parallel>], iteration_bounds = array<i64: 1, 1>, scalar_prefetch = 0 : i64, scratch_operands = 0 : i64, tpu.core_type = #tpu.core_type<tc>, window_params = [{transform_indices = @transform_0, window_bounds = array<i64: 8, 256>}, {transform_indices = @transform_1, window_bounds = array<i64: 8, 1>}, {transform_indices = @transform_2, window_bounds = array<i64: 8, 1>}, {transform_indices = @transform_3, window_bounds = array<i64: 8, 256>}]} {
    %c0 = arith.constant 0 : index
    %c0_0 = arith.constant 0 : index
    %0 = vector.load %arg2[%c0, %c0_0] : memref<8x256xf32, #tpu.memory_space<vmem>>, vector<8x256xf32>
    %c0_1 = arith.constant 0 : index
    %c0_2 = arith.constant 0 : index
    %1 = vector.load %arg3[%c0_1, %c0_2] : memref<8x1xf32, #tpu.memory_space<vmem>>, vector<8x1xf32>
    %2 = vector.broadcast %1 : vector<8x1xf32> to vector<8x256xf32>
    %3 = arith.mulf %0, %2 : vector<8x256xf32>
    %c0_3 = arith.constant 0 : index
    %c0_4 = arith.constant 0 : index
    %4 = vector.load %arg4[%c0_3, %c0_4] : memref<8x1xf32, #tpu.memory_space<vmem>>, vector<8x1xf32>
    %5 = vector.broadcast %4 : vector<8x1xf32> to vector<8x256xf32>
    %6 = arith.addf %3, %5 : vector<8x256xf32>
    %c0_5 = arith.constant 0 : index
    %c0_6 = arith.constant 0 : index
    %7 = vector.load %arg5[%c0_5, %c0_6] : memref<8x256xf32, #tpu.memory_space<vmem>>, vector<8x256xf32>
    tpu.vector_store %arg5[%c0_5, %c0_6], %6 {strides = array<i32>} : memref<8x256xf32, #tpu.memory_space<vmem>>, vector<8x256xf32>,
    return
  }
  func.func @transform_0(%arg0: i32, %arg1: i32) -> (i32, i32) {
    %c0_i32 = arith.constant 0 : i32
    return %arg0, %arg1 : i32, i32
  }
  func.func @transform_1(%arg0: i32, %arg1: i32) -> (i32, i32) {
    %c0_i32 = arith.constant 0 : i32
    %c0_i32_0 = arith.constant 0 : i32
    return %arg0, %c0_i32 : i32, i32
  }
  func.func @transform_2(%arg0: i32, %arg1: i32) -> (i32, i32) {
    %c0_i32 = arith.constant 0 : i32
    %c0_i32_0 = arith.constant 0 : i32
    return %arg0, %c0_i32 : i32, i32
  }
  func.func @transform_3(%arg0: i32, %arg1: i32) -> (i32, i32) {
    %c0_i32 = arith.constant 0 : i32
    return %arg0, %arg1 : i32, i32
  }
}

</mosaic_0001>

<bundles_post_ra>
// kernel: adaptive_instance_norm.2
= control target key start
LH: loop header
LB: loop body
LE: loop exit
PB: predicated region body
PF: predicated region fallthrough
CT: control target
= control target key end

     0   :  { %s64_s0 = inlined_call_operand.vmem [shape: f32[8,256], index: 0, kind: input, shape index: {}]   ;;  %s65_s1 = inlined_call_operand.vmem [shape: f32[8,128], index: 1, kind: output, shape index: {0}]   ;;  %s66_s2 = inlined_call_operand.vmem [shape: f32[8,128], index: 2, kind: output, shape index: {1}]  }
   0x1   :  { %v18_v0 = vld [vmem:[%s64_s0] sm:$0xff]  ;;  %v22_v1 = vld [vmem:[%s64_s0 + $0x8] sm:$0xff] }
   0x2   :  { %v20_v2 = vmul.f32 %v18_v0, %v18_v0  ;;  %v24_v3 = vmul.f32 %v22_v1, %v22_v1  ;;  %v23_v4 = vadd.f32 %v22_v1, %v18_v0 }
   0x4   :  { %26 = vst [vmem:[%s65_s1] sm:$0xff] %v23_v4  ;;  %v25_v5 = vadd.f32 %v24_v3, %v20_v2 }
   0x6   :  { %27 = vst [vmem:[%s66_s2] sm:$0xff] %v25_v5 }

// kernel: adaptive_instance_norm.3
= control target key start
LH: loop header
LB: loop body
LE: loop exit
PB: predicated region body
PF: predicated region fallthrough
CT: control target
= control target key end

     0   :  { %v40_v0 = vmov 0   ;;  %s79_s1 = inlined_call_operand.vmem [shape: f32[8,1], index: 1, kind: input, shape index: {}]   ;;  %s80_s2 = inlined_call_operand.vmem [shape: f32[8,1], index: 2, kind: input, shape index: {}]   ;;  %s81_s0 = inlined_call_operand.vmem [shape: f32[8,256], index: 0, kind: input, shape index: {}]   ;;  %s82_s3 = inlined_call_operand.vmem [shape: f32[8,256], index: 3, kind: output, shape index: {}]  }
   0x1   :  { %39 = vset.pattern.permute.xlu0 %v40_v0  ;;  %v16_v1 = vld [vmem:[%s79_s1] sm:$0xff]  ;;  %v15_v5 = vld [vmem:[%s81_s0 + $0x8] sm:$0xff] }
   0x2   :  { %19 = vperm.xlu0 %39, %v16_v1   ;;  %v24_v2 = vld [vmem:[%s80_s2] sm:$0xff] }
   0x3   :  { %v14_v4 = vld [vmem:[%s81_s0] sm:$0xff] }
   0x6   :  { %27 = vperm.xlu0 %39, %v24_v2  }
  0x7d   :  { %v20_v3 = vpop.permute.xlu0 %19 }
  0x7e   :  { %v22_v6 = vmul.f32 %v20_v3, %v14_v4  ;;  %v23_v7 = vmul.f32 %v20_v3, %v15_v5 }
  0x81   :  { %v28_v8 = vpop.permute.xlu0 %27 }
  0x82   :  { %v30_v9 = vadd.f32 %v28_v8, %v22_v6  ;;  %v31_v10 = vadd.f32 %v28_v8, %v23_v7 }
  0x84   :  { %32 = vst [vmem:[%s82_s3] sm:$0xff] %v30_v9  ;;  %33 = vst [vmem:[%s82_s3 + $0x8] sm:$0xff] %v31_v10 }

</bundles_post_ra>
